<compile_context>
chip_gen: v6e
topology: v6e:2x2x1
jax: 0.10.0
libtpu: 0.0.40
codegen_flags: <defaults>
</compile_context>

<pallas_src>
import jax
import jax.numpy as jnp
from jax.experimental import pallas as pl
from jax.experimental.pallas import tpu as pltpu

_LANE = 128
_TARGET_C = 1024                          # lane width of the flattened slab
_PER_ARRAY_TILE_BYTES = 2 * 1024 * 1024   # ~2 MiB per array per grid step


def _lerp_kernel(ratio_ref, x_ref, y_ref, out_ref):
    # ratio_ref: (1, 1) f32 scalar in SMEM (already sigmoid(ratio_like)).
    ratio = ratio_ref[0, 0].astype(x_ref.dtype)
    x = x_ref[...]
    y = y_ref[...]
    # ratio*x + (1-ratio)*y  ==  y + ratio*(x - y)   (one vmul fewer / element)
    out_ref[...] = (y + ratio * (x - y)).astype(out_ref.dtype)


def _choose_slab(total, itemsize):
    """Pick (lane_width C, rows, tile_rows) for the flattened [rows, C] slab."""
    if total <= _TARGET_C:
        c = -(-total // _LANE) * _LANE            # round up to multiple of 128
    else:
        c = _TARGET_C
    rows = -(-total // c)

    # Rows per grid step targeting ~2 MiB per array per tile.
    tile_rows = max(8, _PER_ARRAY_TILE_BYTES // (c * itemsize))
    tile_rows = min(tile_rows, rows)
    if tile_rows < rows:
        tile_rows = max(8, (tile_rows // 8) * 8)   # (8, 128) sublane rule
    elif rows >= 16:
        # Everything fits in one tile but there is real work: keep >= 2 grid
        # steps so the "parallel" axis gives both TensorCores work on v7x.
        half = max(8, (((rows + 1) // 2) + 7) // 8 * 8)
        if half < rows:
            tile_rows = half
    return c, rows, tile_rows


@jax.jit
def graph_comb_jgcf(x, y, ratio_like):
    """x, y: same shape (e.g. [N, 2*embed_dim]); ratio_like: scalar parameter."""
    assert x.shape == y.shape, "x and y must have the same shape"
    orig_shape = x.shape
    out_dtype = x.dtype
    itemsize = jnp.dtype(out_dtype).itemsize

    total = 1
    for s in orig_shape:
        total *= int(s)

    c, rows, tile_rows = _choose_slab(total, itemsize)
    padded = rows * c

    # Scalar gate: sigmoid computed once in the wrapper, passed via SMEM.
    ratio = jax.nn.sigmoid(jnp.asarray(ratio_like, jnp.float32)).reshape(1, 1)

    def to_slab(a):
        flat = a.reshape(-1)
        if padded != total:
            flat = jnp.pad(flat, (0, padded - total))
        return flat.reshape(rows, c)

    x2 = to_slab(x)
    y2 = to_slab(y)

    grid = (pl.cdiv(rows, tile_rows),)

    out2 = pl.pallas_call(
        _lerp_kernel,
        out_shape=jax.ShapeDtypeStruct((rows, c), out_dtype),
        grid=grid,
        in_specs=[
            pl.BlockSpec(memory_space=pltpu.MemorySpace.SMEM),   # ratio scalar
            pl.BlockSpec((tile_rows, c), lambda i: (i, 0)),      # x slab tile
            pl.BlockSpec((tile_rows, c), lambda i: (i, 0)),      # y slab tile
        ],
        out_specs=pl.BlockSpec((tile_rows, c), lambda i: (i, 0)),
        compiler_params=pltpu.CompilerParams(
            dimension_semantics=("parallel",),   # shards over 2 TCs on v7x
            vmem_limit_bytes=40 * 1024 * 1024,   # safe on v5e/v6e/v7x (64 MiB phys)
        ),
    )(ratio, x2, y2)

    out_flat = out2.reshape(-1)
    if padded != total:
        out_flat = out_flat[:total]
    return out_flat.reshape(orig_shape)


def graph_comb_jgcf_ref(x, y, ratio_like):
    ratio = jax.nn.sigmoid(ratio_like)
    return ratio * x + (1.0 - ratio) * y


if __name__ == "__main__":
    key = jax.random.PRNGKey(0)

    # Case 1: shapes implied by the module (embed_dim=16 -> d=32), small batch.
    embed_dim = 16
    d = 2 * embed_dim
    n = 8
    kx, ky, kr = jax.random.split(key, 3)
    x = jax.random.normal(kx, (n, d), jnp.float32)
    y = jax.random.normal(ky, (n, d), jnp.float32)
    ratio_like = jax.random.normal(kr, (), jnp.float32) * 0.5

    out = graph_comb_jgcf(x, y, ratio_like)
    jax.block_until_ready(out)
    ref = graph_comb_jgcf_ref(x, y, ratio_like)
    assert out.shape == ref.shape
    assert jnp.allclose(out, ref, atol=1e-5, rtol=1e-5), "mismatch (case 1)"

    # Case 2: exercises tail padding + a multi-step grid (still small).
    n2, d2 = 500, 48
    kx2, ky2 = jax.random.split(kx)
    x2 = jax.random.normal(kx2, (n2, d2), jnp.float32)
    y2 = jax.random.normal(ky2, (n2, d2), jnp.float32)
    out2 = graph_comb_jgcf(x2, y2, ratio_like)
    jax.block_until_ready(out2)
    ref2 = graph_comb_jgcf_ref(x2, y2, ratio_like)
    assert out2.shape == ref2.shape
    assert jnp.allclose(out2, ref2, atol=1e-5, rtol=1e-5), "mismatch (case 2)"

    print("KERNEL_OK")
</pallas_src>

<mosaic_0001>
module attributes {stable_mosaic.version = 11 : i64} {
  func.func @_lerp_kernel(%arg0: i32, %arg1: memref<1x1xf32, #tpu.memory_space<smem>>, %arg2: memref<1x256xf32, #tpu.memory_space<vmem>>, %arg3: memref<1x256xf32, #tpu.memory_space<vmem>>, %arg4: memref<1x256xf32, #tpu.memory_space<vmem>>) attributes {dimension_semantics = [#tpu.dimension_semantics<parallel>], iteration_bounds = array<i64: 1>, scalar_prefetch = 0 : i64, scratch_operands = 0 : i64, tpu.core_type = #tpu.core_type<tc>, window_params = [{transform_indices = @transform_0, window_bounds = array<i64: 1, 1>}, {transform_indices = @transform_1, window_bounds = array<i64: 1, 256>}, {transform_indices = @transform_2, window_bounds = array<i64: 1, 256>}, {transform_indices = @transform_3, window_bounds = array<i64: 1, 256>}]} {
    %c0 = arith.constant 0 : index
    %c0_0 = arith.constant 0 : index
    %0 = memref.load %arg1[%c0, %c0_0] : memref<1x1xf32, #tpu.memory_space<smem>>
    %c0_1 = arith.constant 0 : index
    %c0_2 = arith.constant 0 : index
    %1 = vector.load %arg2[%c0_1, %c0_2] : memref<1x256xf32, #tpu.memory_space<vmem>>, vector<1x256xf32>
    %c0_3 = arith.constant 0 : index
    %c0_4 = arith.constant 0 : index
    %2 = vector.load %arg3[%c0_3, %c0_4] : memref<1x256xf32, #tpu.memory_space<vmem>>, vector<1x256xf32>
    %3 = arith.subf %1, %2 : vector<1x256xf32>
    %4 = vector.broadcast %0 : f32 to vector<1x256xf32>
    %5 = arith.mulf %4, %3 : vector<1x256xf32>
    %6 = arith.addf %2, %5 : vector<1x256xf32>
    %c0_5 = arith.constant 0 : index
    %c0_6 = arith.constant 0 : index
    %7 = vector.load %arg4[%c0_5, %c0_6] : memref<1x256xf32, #tpu.memory_space<vmem>>, vector<1x256xf32>
    tpu.vector_store %arg4[%c0_5, %c0_6], %6 {strides = array<i32>} : memref<1x256xf32, #tpu.memory_space<vmem>>, vector<1x256xf32>,
    return
  }
  func.func @transform_0(%arg0: i32) -> (i32, i32) {
    %c0_i32 = arith.constant 0 : i32
    %c0_i32_0 = arith.constant 0 : i32
    %c0_i32_1 = arith.constant 0 : i32
    return %c0_i32, %c0_i32_0 : i32, i32
  }
  func.func @transform_1(%arg0: i32) -> (i32, i32) {
    %c0_i32 = arith.constant 0 : i32
    %c0_i32_0 = arith.constant 0 : i32
    return %arg0, %c0_i32 : i32, i32
  }
  func.func @transform_2(%arg0: i32) -> (i32, i32) {
    %c0_i32 = arith.constant 0 : i32
    %c0_i32_0 = arith.constant 0 : i32
    return %arg0, %c0_i32 : i32, i32
  }
  func.func @transform_3(%arg0: i32) -> (i32, i32) {
    %c0_i32 = arith.constant 0 : i32
    %c0_i32_0 = arith.constant 0 : i32
    return %arg0, %c0_i32 : i32, i32
  }
}

</mosaic_0001>

<bundles_post_ra>
// kernel: graph_comb_jgcf.1
= control target key start
LH: loop header
LB: loop body
LE: loop exit
PB: predicated region body
PF: predicated region fallthrough
CT: control target
= control target key end

     0   :  { %v22_v3 = vlaneseq  ;;  %s63_s0 = inlined_call_operand.<no memory space> [shape: f32[1,1], index: 0, kind: input, shape index: {}]   ;;  %s64_s1 = inlined_call_operand.vmem [shape: f32[1,256], index: 1, kind: input, shape index: {}]   ;;  %s65_s2 = inlined_call_operand.vmem [shape: f32[1,256], index: 2, kind: input, shape index: {}]   ;;  %s66_s3 = inlined_call_operand.vmem [shape: f32[1,256], index: 3, kind: output, shape index: {}]  }
   0x1   :  { %v16_v0 = vld [vmem:[%s64_s1] sm:$0x3]  ;;  %v19_v2 = vstv %s63_s0 }
   0x2   :  { %v17_v1 = vld [vmem:[%s65_s2] sm:$0x3]  ;;  %vm24_vm0 = vcmp.lt.s32.totalorder %v22_v3, 256 }
   0x3   :  { %v18_v4 = vsub.f32 %v16_v0, %v17_v1 }
   0x5   :  { %v20_v5 = vmul.f32 %v19_v2, %v18_v4 }
   0x7   :  { %v21_v6 = vadd.f32 %v20_v5, %v17_v1 }
   0x9   :  { %26 = vst.msk [vmem:[%s66_s3] sm:$0x3] %vm24_vm0, %v21_v6 }

</bundles_post_ra>
